<compile_context>
chip_gen: v5e
topology: v5e:2x2
jax: 0.10.0
libtpu: 0.0.40
codegen_flags: <defaults>
</compile_context>

<pallas_src>
import functools

import jax
import jax.numpy as jnp
from jax.experimental import pallas as pl
from jax.experimental.pallas import tpu as pltpu

_LANE = 128


# --------------------------------------------------------------------------- #
# Pallas kernel: streaming masked reduction of the per-element GAN loss        #
# --------------------------------------------------------------------------- #
def _gan_loss_kernel(x_ref, o_ref, acc_ref, *, mode, target_val, n_valid,
                     tile_rows, scale):
    i = pl.program_id(0)

    @pl.when(i == 0)
    def _init():
        acc_ref[...] = jnp.zeros_like(acc_ref)

    x = x_ref[...].astype(jnp.float32)                      # (tile_rows, 128)

    # mask out zero-padded tail elements (n_valid is a trace-time constant)
    row = jax.lax.broadcasted_iota(jnp.int32, x.shape, 0)
    col = jax.lax.broadcasted_iota(jnp.int32, x.shape, 1)
    flat_idx = i * (tile_rows * _LANE) + row * _LANE + col
    valid = flat_idx < n_valid

    if mode == 'bce':
        # numerically stable BCE-with-logits against constant target
        per = (jnp.maximum(x, 0.0) - x * target_val
               + jnp.log(1.0 + jnp.exp(-jnp.abs(x))))
    elif mode == 'mse':
        d = x - target_val
        per = d * d
    else:  # 'wgan' -- plain mean, sign folded into `scale`
        per = x

    per = jnp.where(valid, per, 0.0)
    # per-lane partial sums only; full cross-lane reduce deferred to last step
    acc_ref[...] += jnp.sum(per, axis=0, keepdims=True)     # (1, 128)

    @pl.when(i == pl.num_programs(0) - 1)
    def _finalize():
        o_ref[...] = jnp.sum(acc_ref[...], keepdims=True) * scale   # (1, 1)


def _gan_loss_pallas(x, *, mode, target_val, sign):
    """Scalar GAN loss over all elements of `x` via a tiled Pallas reduction."""
    xf = jnp.ravel(x).astype(jnp.float32)
    n = xf.shape[0]                                   # static under jit

    rows = pl.cdiv(n, _LANE)
    rows = ((rows + 7) // 8) * 8                      # sublane-align
    tile_rows = min(512, rows)                        # 512*128*4B = 256 KiB/tile
    padded_rows = ((rows + tile_rows - 1) // tile_rows) * tile_rows
    pad = padded_rows * _LANE - n
    if pad:
        xf = jnp.pad(xf, (0, pad))
    x2 = xf.reshape(padded_rows, _LANE)               # lane-dense layout

    scale = (sign if mode == 'wgan' else 1.0) / float(n)

    out = pl.pallas_call(
        functools.partial(_gan_loss_kernel,
                          mode=mode,
                          target_val=float(target_val),
                          n_valid=n,
                          tile_rows=tile_rows,
                          scale=float(scale)),
        out_shape=jax.ShapeDtypeStruct((1, 1), jnp.float32),
        grid=(padded_rows // tile_rows,),
        in_specs=[pl.BlockSpec((tile_rows, _LANE), lambda i: (i, 0))],
        out_specs=pl.BlockSpec((1, 1), lambda i: (0, 0)),
        scratch_shapes=[pltpu.VMEM((1, _LANE), jnp.float32)],
        compiler_params=pltpu.CompilerParams(
            dimension_semantics=("arbitrary",)),      # carried accumulator axis
    )(x2)
    return out[0, 0]


# --------------------------------------------------------------------------- #
# GANLoss module                                                               #
# --------------------------------------------------------------------------- #
class GANLoss:
    def __init__(self, gan_type: str, real_label_val: float = 1.0,
                 fake_label_val: float = 0.0):
        if gan_type == 'gan' or gan_type == 'ragan':
            self._mode = 'bce'
        elif gan_type == 'lsgan':
            self._mode = 'mse'
        elif gan_type == 'wgan-gp':
            self._mode = 'wgan'
        else:
            raise NotImplementedError('GAN type [%s] is not found' % gan_type)
        self.gan_type = gan_type
        self.real_label_val = float(real_label_val)
        self.fake_label_val = float(fake_label_val)

    def __call__(self, x, target_is_real: bool):
        if self._mode == 'wgan':
            # target label is just the bool; only the sign of the mean changes
            sign = -1.0 if target_is_real else 1.0
            return _gan_loss_pallas(x, mode='wgan', target_val=0.0, sign=sign)
        target_val = self.real_label_val if target_is_real else self.fake_label_val
        return _gan_loss_pallas(x, mode=self._mode, target_val=target_val, sign=1.0)


# --------------------------------------------------------------------------- #
# Pure-JAX reference (mirrors nn.BCEWithLogitsLoss / nn.MSELoss / wgan_loss)   #
# --------------------------------------------------------------------------- #
def _reference_loss(x, gan_type, target_is_real, real_val=1.0, fake_val=0.0):
    x = x.astype(jnp.float32)
    if gan_type in ('gan', 'ragan'):
        t = real_val if target_is_real else fake_val
        return jnp.mean(jnp.maximum(x, 0.0) - x * t
                        + jnp.log(1.0 + jnp.exp(-jnp.abs(x))))
    if gan_type == 'lsgan':
        t = real_val if target_is_real else fake_val
        return jnp.mean((x - t) ** 2)
    return -jnp.mean(x) if target_is_real else jnp.mean(x)


if __name__ == "__main__":
    key = jax.random.PRNGKey(0)
    # discriminator-style logits, PyTorch-ish shape (N, C, H, W)
    logits = jax.random.normal(key, (2, 4, 16, 16), dtype=jnp.float32)

    ok = True
    for gan_type in ('gan', 'ragan', 'lsgan', 'wgan-gp'):
        crit = GANLoss(gan_type)
        for target_is_real in (True, False):
            loss = crit(logits, target_is_real)
            loss = jax.block_until_ready(loss)
            ref = _reference_loss(logits, gan_type, target_is_real)
            ok &= bool(jnp.isfinite(loss))
            ok &= bool(jnp.allclose(loss, ref, rtol=1e-4, atol=1e-5))

    assert ok
    print("KERNEL_OK")
</pallas_src>

<mosaic_0001>
module attributes {stable_mosaic.version = 11 : i64} {
  func.func @_gan_loss_kernel(%arg0: i32, %arg1: memref<16x128xf32, #tpu.memory_space<vmem>>, %arg2: memref<1x1xf32, #tpu.memory_space<vmem>>, %arg3: memref<1x128xf32, #tpu.memory_space<vmem>>) attributes {dimension_semantics = [#tpu.dimension_semantics<arbitrary>], iteration_bounds = array<i64: 1>, scalar_prefetch = 0 : i64, scratch_operands = 1 : i64, tpu.core_type = #tpu.core_type<tc>, window_params = [{transform_indices = @transform_0, window_bounds = array<i64: 16, 128>}, {pipeline_mode = #tpu.pipeline_mode<synchronous>, transform_indices = @transform_1, window_bounds = array<i64: 1, 1>}]} {
    %c0_i32 = arith.constant 0 : i32
    %0 = arith.cmpi eq, %arg0, %c0_i32 : i32
    %1 = arith.extui %0 : i1 to i32
    %c0_i32_0 = arith.constant 0 : i32
    %2 = arith.cmpi ne, %1, %c0_i32_0 : i32
    scf.if %2 {
      %cst_14 = arith.constant 0.000000e+00 : f32
      %37 = vector.broadcast %cst_14 : f32 to vector<1x128xf32>
      %c0_15 = arith.constant 0 : index
      %c0_16 = arith.constant 0 : index
      %38 = vector.load %arg3[%c0_15, %c0_16] : memref<1x128xf32, #tpu.memory_space<vmem>>, vector<1x128xf32>
      tpu.vector_store %arg3[%c0_15, %c0_16], %37 {strides = array<i32>} : memref<1x128xf32, #tpu.memory_space<vmem>>, vector<1x128xf32>,
    } else {
    }
    %c0 = arith.constant 0 : index
    %c0_1 = arith.constant 0 : index
    %3 = vector.load %arg1[%c0, %c0_1] : memref<16x128xf32, #tpu.memory_space<vmem>>, vector<16x128xf32>
    %4 = tpu.iota {dimensions = array<i32: 0>} : vector<16x128xi32>
    %5 = tpu.iota {dimensions = array<i32: 1>} : vector<16x128xi32>
    %c2048_i32 = arith.constant 2048 : i32
    %6 = arith.muli %arg0, %c2048_i32 : i32
    %c128_i32 = arith.constant 128 : i32
    %7 = vector.broadcast %c128_i32 : i32 to vector<16x128xi32>
    %8 = arith.muli %4, %7 : vector<16x128xi32>
    %9 = vector.broadcast %6 : i32 to vector<16x128xi32>
    %10 = arith.addi %9, %8 : vector<16x128xi32>
    %11 = arith.addi %10, %5 : vector<16x128xi32>
    %c2048_i32_2 = arith.constant 2048 : i32
    %12 = vector.broadcast %c2048_i32_2 : i32 to vector<16x128xi32>
    %13 = arith.cmpi slt, %11, %12 : vector<16x128xi32>
    %cst = arith.constant 0.000000e+00 : f32
    %14 = vector.broadcast %cst : f32 to vector<16x128xf32>
    %15 = arith.maximumf %3, %14 : vector<16x128xf32>
    %cst_3 = arith.constant 1.000000e+00 : f32
    %16 = vector.broadcast %cst_3 : f32 to vector<16x128xf32>
    %17 = arith.mulf %3, %16 : vector<16x128xf32>
    %18 = arith.subf %15, %17 : vector<16x128xf32>
    %19 = math.absf %3 : vector<16x128xf32>
    %cst_4 = arith.constant 0.000000e+00 : f32
    %20 = vector.broadcast %cst_4 : f32 to vector<16x128xf32>
    %21 = arith.subf %20, %19 : vector<16x128xf32>
    %22 = math.exp %21 : vector<16x128xf32>
    %cst_5 = arith.constant 1.000000e+00 : f32
    %23 = vector.broadcast %cst_5 : f32 to vector<16x128xf32>
    %24 = arith.addf %23, %22 : vector<16x128xf32>
    %25 = math.log %24 : vector<16x128xf32>
    %26 = arith.addf %18, %25 : vector<16x128xf32>
    %cst_6 = arith.constant 0.000000e+00 : f32
    %27 = vector.broadcast %cst_6 : f32 to vector<16x128xf32>
    %28 = arith.select %13, %26, %27 : vector<16x128xi1>, vector<16x128xf32>
    %c0_7 = arith.constant 0 : index
    %c0_8 = arith.constant 0 : index
    %29 = vector.load %arg3[%c0_7, %c0_8] : memref<1x128xf32, #tpu.memory_space<vmem>>, vector<1x128xf32>
    %cst_9 = arith.constant dense<0.000000e+00> : vector<128xf32>
    %30 = vector.multi_reduction <add>, %28, %cst_9 [0] : vector<16x128xf32> to vector<128xf32>
    %31 = vector.shape_cast %30 : vector<128xf32> to vector<1x128xf32>
    %32 = arith.addf %29, %31 : vector<1x128xf32>
    %c0_10 = arith.constant 0 : index
    %c0_11 = arith.constant 0 : index
    %33 = vector.load %arg3[%c0_10, %c0_11] : memref<1x128xf32, #tpu.memory_space<vmem>>, vector<1x128xf32>
    tpu.vector_store %arg3[%c0_10, %c0_11], %32 {strides = array<i32>} : memref<1x128xf32, #tpu.memory_space<vmem>>, vector<1x128xf32>,
    %c0_i32_12 = arith.constant 0 : i32
    %34 = arith.cmpi eq, %arg0, %c0_i32_12 : i32
    %35 = arith.extui %34 : i1 to i32
    %c0_i32_13 = arith.constant 0 : i32
    %36 = arith.cmpi ne, %35, %c0_i32_13 : i32
    scf.if %36 {
      %c0_14 = arith.constant 0 : index
      %c0_15 = arith.constant 0 : index
      %37 = vector.load %arg3[%c0_14, %c0_15] : memref<1x128xf32, #tpu.memory_space<vmem>>, vector<1x128xf32>
      %38 = vector.shape_cast %37 : vector<1x128xf32> to vector<1x1x128xf32>
      %cst_16 = arith.constant dense<0.000000e+00> : vector<1xf32>
      %39 = vector.multi_reduction <add>, %38, %cst_16 [1, 2] : vector<1x1x128xf32> to vector<1xf32>
      %40 = vector.shape_cast %39 : vector<1xf32> to vector<1x1x1xf32>
      %41 = vector.extract %40[0, 0, 0] : f32 from vector<1x1x1xf32>
      %42 = vector.broadcast %41 : f32 to vector<1x1xf32>
      %cst_17 = arith.constant 4.8828125E-4 : f32
      %43 = vector.broadcast %cst_17 : f32 to vector<1x1xf32>
      %44 = arith.mulf %42, %43 : vector<1x1xf32>
      %c0_18 = arith.constant 0 : index
      %c0_19 = arith.constant 0 : index
      %45 = vector.load %arg2[%c0_18, %c0_19] : memref<1x1xf32, #tpu.memory_space<vmem>>, vector<1x1xf32>
      tpu.vector_store %arg2[%c0_18, %c0_19], %44 {strides = array<i32>} : memref<1x1xf32, #tpu.memory_space<vmem>>, vector<1x1xf32>,
    } else {
    }
    return
  }
  func.func @transform_0(%arg0: i32) -> (i32, i32) {
    %c0_i32 = arith.constant 0 : i32
    %c0_i32_0 = arith.constant 0 : i32
    return %arg0, %c0_i32 : i32, i32
  }
  func.func @transform_1(%arg0: i32) -> (i32, i32) {
    %c0_i32 = arith.constant 0 : i32
    %c0_i32_0 = arith.constant 0 : i32
    %c0_i32_1 = arith.constant 0 : i32
    return %c0_i32, %c0_i32_0 : i32, i32
  }
}

</mosaic_0001>

<bundles_post_ra>
// kernel: tpu_custom_call.1
= control target key start
LH: loop header
LB: loop body
LE: loop exit
PB: predicated region body
PF: predicated region fallthrough
CT: control target
= control target key end

     0   :  { %6 = vsyncpa [#allocation4], 0  ;;  %s203_s0 = inlined_call_operand.hbm [shape: f32[16,128], index: 0, kind: input, shape index: {}]   ;;  %s204_s1 = inlined_call_operand.hbm [shape: f32[1,1], index: 1, kind: output, shape index: {}]  }
   0x1   :  { %7 = vsyncpa [#allocation5], 0  ;;  %s12_s8 = sshll.u32 %s203_s0, 4  ;;  %s182_s9 = smov [#allocation3]   ;;  %s13_s8 = int_to_ptr.hbm [resolvable:$true] %s12_s8 }
   0x2   :  { %s14_s10 = sshll.u32 %s182_s9, 4  ;;  %s183_s11 = smov 128   ;;  %s15_s10 = int_to_ptr.vmem [resolvable:$true] %s14_s10 }
   0x3   :  { %s184_s12 = smov 8  }
   0x4   :  { %20 = dma.hbm_to_vmem [thread:$0]  %s13_s8, 256, %s15_s10, [#allocation4], %s183_s11, %s183_s11, %s184_s12  }
   0x5   :  { %178 = dma.done.wait [#allocation4], 256  }
   0x6   :  { %179 = vsyncadd [#allocation4], 4294967040  ;;  %v185_v0 = vmov 0.0   ;;  %v30_v1 = vld [vmem:[#allocation3] sm:$0xff]  ;;  %v31_v2 = vld [vmem:[#allocation3 + $0x8] sm:$0xff]  ;;  %v32_v7 = vlaneseq  ;;  %vm83_vm2 = vcmask 1040384  }
   0x7   :  { %29 = vst [vmem:[#allocation2] sm:$0x1] %v185_v0  ;;  %v51_v3 = vand.u32 2147483647, %v30_v1  ;;  %v52_v4 = vand.u32 2147483647, %v31_v2 }
   0x8   :  { %v33_v10 = vshrl.u32 %v32_v7, 7  ;;  %v36_v16 = vand.u32 127, %v32_v7  ;;  %v47_v19 = vmax.f32 %v30_v1, 0.0  ;;  %v48_v20 = vmax.f32 %v31_v2, 0.0  ;;  %s186_s0 = smov [#allocation6]   ;;  %s105_s16 = sshll.u32 %s204_s1, 4  ;;  %s106_s16 = int_to_ptr.hbm [resolvable:$true] %s105_s16 }
   0x9   :  { %v53_v5 = vsub.f32 0.0, %v51_v3  ;;  %v54_v6 = vsub.f32 0.0, %v52_v4  ;;  %s103_s13 = sshll.u32 %s186_s0, 4  ;;  %vm96_vm3 = vcmask 0   ;;  %s104_s13 = int_to_ptr.vmem [resolvable:$true] %s103_s13 }
   0xa   :  { %v34_v12 = vadd.s32 8, %v33_v10  ;;  %v38_v17 = vmul.u32 128, %v33_v10  ;;  %v49_v23 = vsub.f32 %v47_v19, %v30_v1  ;;  %v50_v25 = vsub.f32 %v48_v20, %v31_v2 }
   0xb   :  { %v55_v8 = vmul.f32 1.442695, %v53_v5  ;;  %v57_v9 = vmul.f32 1.442695, %v54_v6 }
   0xc   :  { %v39_v18 = vmul.u32 128, %v34_v12  ;;  %v43_v21 = vadd.s32 %v38_v17, %v36_v16 }
   0xd   :  { %122 = vpow2.f32 %v55_v8 }
   0xe   :  { %124 = vpow2.f32 %v57_v9  ;;  %v44_v22 = vadd.s32 %v39_v18, %v36_v16  ;;  %vm45_vm0 = vcmp.lt.s32.totalorder %v43_v21, 2048  ;;  %v69_v39 = vld [vmem:[#allocation2] sm:$0x1] }
  0x10   :  { %vm46_vm1 = vcmp.lt.s32.totalorder %v44_v22, 2048 }
  0x13   :  { %v123_v11 = vpop.eup %122 }
  0x14   :  { %v125_v13 = vpop.eup %124  ;;  %v59_v14 = vadd.f32 1.0, %v123_v11 }
  0x15   :  { %v60_v15 = vadd.f32 1.0, %v125_v13 }
  0x16   :  { %126 = vlog2.f32 %v59_v14 }
  0x17   :  { %128 = vlog2.f32 %v60_v15 }
  0x1c   :  { %v127_v24 = vpop.eup %126 }
  0x1d   :  { %v129_v26 = vpop.eup %128  ;;  %v62_v27 = vmul.f32 0.6931472, %v127_v24 }
  0x1e   :  { %v64_v28 = vmul.f32 0.6931472, %v129_v26 }
  0x1f   :  { %v65_v29 = vadd.f32 %v62_v27, %v49_v23 }
  0x20   :  { %v66_v30 = vadd.f32 %v64_v28, %v50_v25 }
  0x21   :  { %v67_v31 = vsel %vm45_vm0, %v65_v29, 0.0 }
  0x22   :  { %v68_v32 = vsel %vm46_vm1, %v66_v30, 0.0 }
  0x23   :  { %v70_v33 = vadd.f32 %v68_v32, %v67_v31 }
  0x25   :  { %v71_v34 = vrot.slane %v70_v33, 4 }
  0x27   :  { %v72_v35 = vadd.f32 %v71_v34, %v70_v33 }
  0x29   :  { %v73_v36 = vrot.slane %v72_v35, 2 }
  0x2b   :  { %v74_v37 = vadd.f32 %v73_v36, %v72_v35 }
  0x2d   :  { %v75_v38 = vrot.slane %v74_v37, 1 }
  0x2f   :  { %v76_v40 = vadd.f32 %v75_v38, %v74_v37 }
  0x31   :  { %v77_v41 = vadd.f32 %v76_v40, %v69_v39 }
  0x33   :  { %78 = vst [vmem:[#allocation2] sm:$0x1] %v77_v41 }
  0x3a   :  { %v82_v42 = vld [vmem:[#allocation2] sm:$0x1] }
  0x3b   :  { %v84_v43 = vsel %vm83_vm2, %v82_v42, 0.0 }
  0x3c   :  { %85 = vadd.xlane.f32.xlu0 %v84_v43 }
  0xaf   :  { %v86_v44 = vpop.xlane.xlu0 %85 }
  0xb0   :  { %v87_v45 = vrot.slane %v86_v44, 4 }
  0xb2   :  { %v88_v46 = vadd.f32 %v87_v45, %v86_v44 }
  0xb4   :  { %v89_v47 = vrot.slane %v88_v46, 2 }
  0xb6   :  { %v90_v48 = vadd.f32 %v89_v47, %v88_v46 }
  0xb8   :  { %v91_v49 = vrot.slane %v90_v48, 1 }
  0xba   :  { %v92_v50 = vadd.f32 %v91_v49, %v90_v48 }
  0xbc   :  { %115 = vpush %v92_v50 }
  0xed   :  { %s116_s17 = spop %115 }
  0xee   :  { %v94_v51 = vstv %s116_s17 }
  0xef   :  { %v95_v52 = vmul.f32 0.00048828125, %v94_v51 }
  0xf1   :  { %97 = vst.msk [vmem:[#allocation6] sm:$0x1] %vm96_vm3, %v95_v52 }
  0xf2   :  { %108 = dma.vmem_to_hbm [thread:$0]  %s104_s13, 16, %s106_s16, [#allocation5]  }
  0xf3   :  { %180 = dma.done.wait [#allocation5], 16  }
  0xf4   :  { %181 = vsyncadd [#allocation5], 4294967280 }
  0xf5   :  { %113 = vsyncpa [#allocation4], 1 }
  0xf6   :  { %114 = vsyncpa [#allocation5], 1 }

</bundles_post_ra>
